<compile_context>
chip_gen: v5e
topology: v5e:2x2
jax: 0.10.0
libtpu: 0.0.40
codegen_flags: <defaults>
</compile_context>

<pallas_src>
import functools

import jax
import jax.numpy as jnp
from jax.experimental import pallas as pl
from jax.experimental.pallas import tpu as pltpu


def _mlp_concat_kernel(x1t_ref, x2t_ref,
                       w1a_ref, w1b_ref, b1_ref,
                       w2_ref, b2_ref,
                       wo_ref, bo_ref,
                       sim_ref):
    """All activations in transposed layout: (features, batch_tile)."""
    # First layer without the torch.cat:  W1 @ [x1; x2] = W1a @ x1 + W1b @ x2.
    h = (jnp.dot(w1a_ref[...], x1t_ref[...], preferred_element_type=jnp.float32)
         + jnp.dot(w1b_ref[...], x2t_ref[...], preferred_element_type=jnp.float32)
         + b1_ref[...])                                        # (h1, TB) f32
    h = jnp.maximum(h, 0.0)

    # Second hidden layer.
    h = jnp.dot(w2_ref[...], h.astype(w2_ref.dtype),
                preferred_element_type=jnp.float32) + b2_ref[...]
    h = jnp.maximum(h, 0.0)                                    # (h2, TB) f32

    # Output head (out_features == 1): VPU multiply + sublane reduce instead
    # of a 1-row MXU push; result is already lane-dense (1, TB).
    logit = jnp.sum(h * wo_ref[...].astype(jnp.float32), axis=0, keepdims=True)
    logit = logit + bo_ref[0]                                  # scalar bias (SMEM)
    sim_ref[...] = jax.nn.sigmoid(logit)


def mlp_concat_forward(x1, x2, params, return_only_hash=False,
                       compute_dtype=jnp.float32, block_b=None):
    """Pallas implementation of MLPConcat.forward.

    params are PyTorch-native: (w1 [h1, 2*x_dim], b1 [h1],
                                w2 [h2, h1],      b2 [h2],
                                wo [1, h2],       bo [1]).
    """
    out1, out2 = x1, x2
    if return_only_hash:
        return out1, out2

    w1, b1, w2, b2, wo, bo = params
    B, x_dim = x1.shape
    h1 = w1.shape[0]
    h2 = w2.shape[0]
    cd = compute_dtype

    # Transposed, lane-dense layout: batch is the last (lane) dimension.
    x1t = x1.astype(cd).T                           # (x_dim, B)
    x2t = x2.astype(cd).T
    w1a = w1[:, :x_dim].astype(cd)                  # (h1, x_dim)
    w1b = w1[:, x_dim:].astype(cd)                  # (h1, x_dim)
    b1c = b1.reshape(h1, 1).astype(jnp.float32)     # bias as column
    w2c = w2.astype(cd)                             # (h2, h1)
    b2c = b2.reshape(h2, 1).astype(jnp.float32)
    woc = wo.reshape(h2, 1).astype(cd)              # head weight as column
    bos = bo.reshape(1).astype(jnp.float32)         # scalar bias -> SMEM

    # Batch tile: one big lane-dense tile per grid step.
    if block_b is not None:
        TB = block_b
    elif B <= 1024:
        TB = B                                      # single full-extent tile
    else:
        TB = 1024                                   # multiple of 128
    n_tiles = pl.cdiv(B, TB)
    Bp = n_tiles * TB
    if Bp != B:                                     # pad ragged batch on lanes
        x1t = jnp.pad(x1t, ((0, 0), (0, Bp - B)))
        x2t = jnp.pad(x2t, ((0, 0), (0, Bp - B)))

    sim_row = pl.pallas_call(
        _mlp_concat_kernel,
        out_shape=jax.ShapeDtypeStruct((1, Bp), jnp.float32),
        grid=(n_tiles,),
        in_specs=[
            pl.BlockSpec((x_dim, TB), lambda i: (0, i)),          # x1^T
            pl.BlockSpec((x_dim, TB), lambda i: (0, i)),          # x2^T
            pl.BlockSpec((h1, x_dim), lambda i: (0, 0)),          # W1[:, :x_dim]
            pl.BlockSpec((h1, x_dim), lambda i: (0, 0)),          # W1[:, x_dim:]
            pl.BlockSpec((h1, 1), lambda i: (0, 0)),              # b1
            pl.BlockSpec((h2, h1), lambda i: (0, 0)),             # W2
            pl.BlockSpec((h2, 1), lambda i: (0, 0)),              # b2
            pl.BlockSpec((h2, 1), lambda i: (0, 0)),              # wo (column)
            pl.BlockSpec(memory_space=pltpu.MemorySpace.SMEM),    # bo scalar
        ],
        out_specs=pl.BlockSpec((1, TB), lambda i: (0, i)),        # lane-dense out
        compiler_params=pltpu.CompilerParams(
            dimension_semantics=("parallel",)),
    )(x1t, x2t, w1a, w1b, b1c, w2c, b2c, woc, bos)

    # Drop padding, then mimic torch's .squeeze().
    similarity = jnp.squeeze(sim_row[0, :B])
    return out1, out2, similarity


def init_params(key, x_dim, hidden_dims):
    """Deterministic Linear params in PyTorch-native [out, in] form."""
    dims = [2 * x_dim] + list(hidden_dims) + [1]
    params = []
    for i in range(len(dims) - 1):
        fan_in, fan_out = dims[i], dims[i + 1]
        key, kw, kb = jax.random.split(key, 3)
        bound = 1.0 / jnp.sqrt(fan_in)
        w = jax.random.uniform(kw, (fan_out, fan_in), jnp.float32, -bound, bound)
        b = jax.random.uniform(kb, (fan_out,), jnp.float32, -bound, bound)
        params += [w, b]
    return tuple(params)


def _reference_forward(x1, x2, params):
    w1, b1, w2, b2, wo, bo = params
    x = jnp.concatenate([x1, x2], axis=1)
    h = jnp.maximum(x @ w1.T + b1, 0.0)
    h = jnp.maximum(h @ w2.T + b2, 0.0)
    return jnp.squeeze(jax.nn.sigmoid(h @ wo.T + bo))


if __name__ == "__main__":
    x_dim = 16            # x_dim == h_dim (asserted in the torch module)
    hidden_dims = (32, 32)

    key = jax.random.PRNGKey(0)
    kp, kd = jax.random.split(key)
    params = init_params(kp, x_dim, hidden_dims)

    fwd_f32 = jax.jit(functools.partial(mlp_concat_forward, params=params))

    # --- small shape consistent with the module (batch=2) ---
    batch = 2
    k1, k2 = jax.random.split(kd)
    x1 = jax.random.normal(k1, (batch, x_dim), jnp.float32)
    x2 = jax.random.normal(k2, (batch, x_dim), jnp.float32)

    out1, out2, sim = jax.block_until_ready(fwd_f32(x1, x2))
    ref = _reference_forward(x1, x2, params)
    assert out1.shape == (batch, x_dim) and out2.shape == (batch, x_dim)
    assert sim.shape == (batch,)
    assert jnp.allclose(sim, ref, atol=1e-5, rtol=1e-5)

    # --- larger ragged batch: exercises TB=1024 tiling, lane padding and the
    #     "parallel" grid axis ---
    batch_l = 1500
    k3, k4 = jax.random.split(k1)
    x1l = jax.random.normal(k3, (batch_l, x_dim), jnp.float32)
    x2l = jax.random.normal(k4, (batch_l, x_dim), jnp.float32)
    _, _, sim_l = jax.block_until_ready(fwd_f32(x1l, x2l))
    ref_l = _reference_forward(x1l, x2l, params)
    assert sim_l.shape == (batch_l,)
    assert jnp.allclose(sim_l, ref_l, atol=1e-5, rtol=1e-5)

    # --- bf16 compute path (halved DMA bytes / 2x MXU rate on v6e/v7x),
    #     f32 accumulation + f32 elementwise math (v5e-safe) ---
    fwd_bf16 = jax.jit(functools.partial(mlp_concat_forward, params=params,
                                         compute_dtype=jnp.bfloat16))
    _, _, sim_b = jax.block_until_ready(fwd_bf16(x1l, x2l))
    assert sim_b.shape == (batch_l,)
    assert float(jnp.max(jnp.abs(sim_b - ref_l))) < 5e-2

    # return_only_hash path (identity).
    o1, o2 = mlp_concat_forward(x1, x2, params, return_only_hash=True)
    assert o1 is x1 and o2 is x2

    print("KERNEL_OK")
</pallas_src>

<mosaic_0001>
module attributes {stable_mosaic.version = 11 : i64} {
  func.func @_mlp_concat_kernel(%arg0: i32, %arg1: memref<16x2xf32, #tpu.memory_space<vmem>>, %arg2: memref<16x2xf32, #tpu.memory_space<vmem>>, %arg3: memref<32x16xf32, #tpu.memory_space<vmem>>, %arg4: memref<32x16xf32, #tpu.memory_space<vmem>>, %arg5: memref<32x1xf32, #tpu.memory_space<vmem>>, %arg6: memref<32x32xf32, #tpu.memory_space<vmem>>, %arg7: memref<32x1xf32, #tpu.memory_space<vmem>>, %arg8: memref<32x1xf32, #tpu.memory_space<vmem>>, %arg9: memref<1xf32, #tpu.memory_space<smem>>, %arg10: memref<1x2xf32, #tpu.memory_space<vmem>>) attributes {dimension_semantics = [#tpu.dimension_semantics<parallel>], iteration_bounds = array<i64: 1>, scalar_prefetch = 0 : i64, scratch_operands = 0 : i64, tpu.core_type = #tpu.core_type<tc>, window_params = [{transform_indices = @transform_0, window_bounds = array<i64: 16, 2>}, {transform_indices = @transform_1, window_bounds = array<i64: 16, 2>}, {pipeline_mode = #tpu.pipeline_mode<synchronous>, transform_indices = @transform_2, window_bounds = array<i64: 32, 16>}, {pipeline_mode = #tpu.pipeline_mode<synchronous>, transform_indices = @transform_3, window_bounds = array<i64: 32, 16>}, {pipeline_mode = #tpu.pipeline_mode<synchronous>, transform_indices = @transform_4, window_bounds = array<i64: 32, 1>}, {pipeline_mode = #tpu.pipeline_mode<synchronous>, transform_indices = @transform_5, window_bounds = array<i64: 32, 32>}, {pipeline_mode = #tpu.pipeline_mode<synchronous>, transform_indices = @transform_6, window_bounds = array<i64: 32, 1>}, {pipeline_mode = #tpu.pipeline_mode<synchronous>, transform_indices = @transform_7, window_bounds = array<i64: 32, 1>}, {transform_indices = @transform_8, window_bounds = array<i64: 1>}, {transform_indices = @transform_9, window_bounds = array<i64: 1, 2>}]} {
    %c0 = arith.constant 0 : index
    %c0_0 = arith.constant 0 : index
    %0 = vector.load %arg3[%c0, %c0_0] : memref<32x16xf32, #tpu.memory_space<vmem>>, vector<32x16xf32>
    %c0_1 = arith.constant 0 : index
    %c0_2 = arith.constant 0 : index
    %1 = vector.load %arg1[%c0_1, %c0_2] : memref<16x2xf32, #tpu.memory_space<vmem>>, vector<16x2xf32>
    %cst = arith.constant dense<0.000000e+00> : vector<32x2xf32>
    %2 = tpu.matmul %0, %1, %cst {dimension_numbers = #tpu.dot_dimension_numbers<[1], [0], [0], [1], [0, 0, 1, 1], [], []>} : vector<32x16xf32>, vector<16x2xf32>, vector<32x2xf32> -> vector<32x2xf32>
    %c0_3 = arith.constant 0 : index
    %c0_4 = arith.constant 0 : index
    %3 = vector.load %arg4[%c0_3, %c0_4] : memref<32x16xf32, #tpu.memory_space<vmem>>, vector<32x16xf32>
    %c0_5 = arith.constant 0 : index
    %c0_6 = arith.constant 0 : index
    %4 = vector.load %arg2[%c0_5, %c0_6] : memref<16x2xf32, #tpu.memory_space<vmem>>, vector<16x2xf32>
    %cst_7 = arith.constant dense<0.000000e+00> : vector<32x2xf32>
    %5 = tpu.matmul %3, %4, %cst_7 {dimension_numbers = #tpu.dot_dimension_numbers<[1], [0], [0], [1], [0, 0, 1, 1], [], []>} : vector<32x16xf32>, vector<16x2xf32>, vector<32x2xf32> -> vector<32x2xf32>
    %6 = arith.addf %2, %5 : vector<32x2xf32>
    %c0_8 = arith.constant 0 : index
    %c0_9 = arith.constant 0 : index
    %7 = vector.load %arg5[%c0_8, %c0_9] : memref<32x1xf32, #tpu.memory_space<vmem>>, vector<32x1xf32>
    %8 = vector.broadcast %7 : vector<32x1xf32> to vector<32x2xf32>
    %9 = arith.addf %6, %8 : vector<32x2xf32>
    %cst_10 = arith.constant 0.000000e+00 : f32
    %10 = vector.broadcast %cst_10 : f32 to vector<32x2xf32>
    %11 = arith.maximumf %9, %10 : vector<32x2xf32>
    %c0_11 = arith.constant 0 : index
    %c0_12 = arith.constant 0 : index
    %12 = vector.load %arg6[%c0_11, %c0_12] : memref<32x32xf32, #tpu.memory_space<vmem>>, vector<32x32xf32>
    %cst_13 = arith.constant dense<0.000000e+00> : vector<32x2xf32>
    %13 = tpu.matmul %12, %11, %cst_13 {dimension_numbers = #tpu.dot_dimension_numbers<[1], [0], [0], [1], [0, 0, 1, 1], [], []>} : vector<32x32xf32>, vector<32x2xf32>, vector<32x2xf32> -> vector<32x2xf32>
    %c0_14 = arith.constant 0 : index
    %c0_15 = arith.constant 0 : index
    %14 = vector.load %arg7[%c0_14, %c0_15] : memref<32x1xf32, #tpu.memory_space<vmem>>, vector<32x1xf32>
    %15 = vector.broadcast %14 : vector<32x1xf32> to vector<32x2xf32>
    %16 = arith.addf %13, %15 : vector<32x2xf32>
    %cst_16 = arith.constant 0.000000e+00 : f32
    %17 = vector.broadcast %cst_16 : f32 to vector<32x2xf32>
    %18 = arith.maximumf %16, %17 : vector<32x2xf32>
    %c0_17 = arith.constant 0 : index
    %c0_18 = arith.constant 0 : index
    %19 = vector.load %arg8[%c0_17, %c0_18] : memref<32x1xf32, #tpu.memory_space<vmem>>, vector<32x1xf32>
    %20 = vector.broadcast %19 : vector<32x1xf32> to vector<32x2xf32>
    %21 = arith.mulf %18, %20 : vector<32x2xf32>
    %cst_19 = arith.constant dense<0.000000e+00> : vector<2xf32>
    %22 = vector.multi_reduction <add>, %21, %cst_19 [0] : vector<32x2xf32> to vector<2xf32>
    %23 = vector.shape_cast %22 : vector<2xf32> to vector<1x2xf32>
    %c0_20 = arith.constant 0 : index
    %24 = memref.load %arg9[%c0_20] : memref<1xf32, #tpu.memory_space<smem>>
    %25 = vector.broadcast %24 : f32 to vector<1x2xf32>
    %26 = arith.addf %23, %25 : vector<1x2xf32>
    %27 = arith.negf %26 : vector<1x2xf32>
    %28 = math.exp %27 : vector<1x2xf32>
    %cst_21 = arith.constant 1.000000e+00 : f32
    %29 = vector.broadcast %cst_21 : f32 to vector<1x2xf32>
    %30 = arith.addf %29, %28 : vector<1x2xf32>
    %31 = arith.divf %29, %30 : vector<1x2xf32>
    %c0_22 = arith.constant 0 : index
    %c0_23 = arith.constant 0 : index
    %32 = vector.load %arg10[%c0_22, %c0_23] : memref<1x2xf32, #tpu.memory_space<vmem>>, vector<1x2xf32>
    tpu.vector_store %arg10[%c0_22, %c0_23], %31 {strides = array<i32>} : memref<1x2xf32, #tpu.memory_space<vmem>>, vector<1x2xf32>,
    return
  }
  func.func @transform_0(%arg0: i32) -> (i32, i32) {
    %c0_i32 = arith.constant 0 : i32
    %c0_i32_0 = arith.constant 0 : i32
    return %c0_i32, %arg0 : i32, i32
  }
  func.func @transform_1(%arg0: i32) -> (i32, i32) {
    %c0_i32 = arith.constant 0 : i32
    %c0_i32_0 = arith.constant 0 : i32
    return %c0_i32, %arg0 : i32, i32
  }
  func.func @transform_2(%arg0: i32) -> (i32, i32) {
    %c0_i32 = arith.constant 0 : i32
    %c0_i32_0 = arith.constant 0 : i32
    %c0_i32_1 = arith.constant 0 : i32
    return %c0_i32, %c0_i32_0 : i32, i32
  }
  func.func @transform_3(%arg0: i32) -> (i32, i32) {
    %c0_i32 = arith.constant 0 : i32
    %c0_i32_0 = arith.constant 0 : i32
    %c0_i32_1 = arith.constant 0 : i32
    return %c0_i32, %c0_i32_0 : i32, i32
  }
  func.func @transform_4(%arg0: i32) -> (i32, i32) {
    %c0_i32 = arith.constant 0 : i32
    %c0_i32_0 = arith.constant 0 : i32
    %c0_i32_1 = arith.constant 0 : i32
    return %c0_i32, %c0_i32_0 : i32, i32
  }
  func.func @transform_5(%arg0: i32) -> (i32, i32) {
    %c0_i32 = arith.constant 0 : i32
    %c0_i32_0 = arith.constant 0 : i32
    %c0_i32_1 = arith.constant 0 : i32
    return %c0_i32, %c0_i32_0 : i32, i32
  }
  func.func @transform_6(%arg0: i32) -> (i32, i32) {
    %c0_i32 = arith.constant 0 : i32
    %c0_i32_0 = arith.constant 0 : i32
    %c0_i32_1 = arith.constant 0 : i32
    return %c0_i32, %c0_i32_0 : i32, i32
  }
  func.func @transform_7(%arg0: i32) -> (i32, i32) {
    %c0_i32 = arith.constant 0 : i32
    %c0_i32_0 = arith.constant 0 : i32
    %c0_i32_1 = arith.constant 0 : i32
    return %c0_i32, %c0_i32_0 : i32, i32
  }
  func.func @transform_8(%arg0: i32) -> i32 {
    %c0_i32 = arith.constant 0 : i32
    %c0_i32_0 = arith.constant 0 : i32
    return %c0_i32 : i32
  }
  func.func @transform_9(%arg0: i32) -> (i32, i32) {
    %c0_i32 = arith.constant 0 : i32
    %c0_i32_0 = arith.constant 0 : i32
    return %c0_i32, %arg0 : i32, i32
  }
}

</mosaic_0001>

<bundles_post_ra>
// kernel: mlp_concat_forward.1
= control target key start
LH: loop header
LB: loop body
LE: loop exit
PB: predicated region body
PF: predicated region fallthrough
CT: control target
= control target key end

     0   :  { %15 = vsyncpa [#allocation4], 0  ;;  %s695_s0 = inlined_call_operand.vmem [shape: f32[16,2], index: 0, kind: input, shape index: {}]   ;;  %s696_s1 = inlined_call_operand.vmem [shape: f32[16,2], index: 1, kind: input, shape index: {}]   ;;  %s697_s2 = inlined_call_operand.hbm [shape: f32[32,16], index: 2, kind: input, shape index: {}]   ;;  %s698_s3 = inlined_call_operand.vmem [shape: f32[32,16], index: 3, kind: input, shape index: {}]   ;;  %s699_s4 = inlined_call_operand.hbm [shape: f32[32,1], index: 4, kind: input, shape index: {}]   ;;  %s700_s5 = inlined_call_operand.hbm [shape: f32[32,32], index: 5, kind: input, shape index: {}]   ;;  %s701_s6 = inlined_call_operand.hbm [shape: f32[32,1], index: 6, kind: input, shape index: {}]   ;;  %s702_s7 = inlined_call_operand.hbm [shape: f32[32,1], index: 7, kind: input, shape index: {}]   ;;  %s703_s8 = inlined_call_operand.<no memory space> [shape: f32[1], index: 8, kind: input, shape index: {}]   ;;  %s704_s9 = inlined_call_operand.hbm [shape: f32[1,2], index: 9, kind: output, shape index: {}]  }
   0x1   :  { %16 = vsyncpa [#allocation7], 0 }
   0x2   :  { %17 = vsyncpa [#allocation10], 0 }
   0x3   :  { %18 = vsyncpa [#allocation5], 0  ;;  %s42_s11 = sshll.u32 %s699_s4, 4  ;;  %s583_s12 = smov [#allocation6]   ;;  %s43_s11 = int_to_ptr.hbm [resolvable:$true] %s42_s11 }
   0x4   :  { %s44_s13 = sshll.u32 %s583_s12, 4  ;;  %s68_s16 = sshll.u32 %s701_s6, 4  ;;  %s45_s13 = int_to_ptr.vmem [resolvable:$true] %s44_s13  ;;  %s69_s16 = int_to_ptr.hbm [resolvable:$true] %s68_s16 }
   0x5   :  { %s584_s17 = smov 128   ;;  %s585_s18 = smov 8  }
   0x6   :  { %50 = dma.hbm_to_vmem [thread:$0]  %s43_s11, 512, %s45_s13, [#allocation7], %s584_s17, %s584_s17, %s585_s18  }
   0x7   :  { %s586_s19 = smov [#allocation9]   ;;  %s27_s23 = sshll.u32 %s697_s2, 4  ;;  %s28_s23 = int_to_ptr.hbm [resolvable:$true] %s27_s23 }
   0x8   :  { %s70_s20 = sshll.u32 %s586_s19, 4  ;;  %s55_s25 = sshll.u32 %s700_s5, 4  ;;  %s71_s20 = int_to_ptr.vmem [resolvable:$true] %s70_s20  ;;  %s56_s25 = int_to_ptr.hbm [resolvable:$true] %s55_s25 }
   0x9   :  { %76 = dma.hbm_to_vmem [thread:$0]  %s69_s16, 512, %s71_s20, [#allocation10], %s584_s17, %s584_s17, %s585_s18  }
   0xa   :  { %s587_s26 = smov [#allocation3]   ;;  %s588_s6 = smov [#allocation8]  }
   0xb   :  { %s29_s27 = sshll.u32 %s587_s26, 4  ;;  %s57_s28 = sshll.u32 %s588_s6, 4  ;;  %s30_s27 = int_to_ptr.vmem [resolvable:$true] %s29_s27  ;;  %s58_s28 = int_to_ptr.vmem [resolvable:$true] %s57_s28 }
   0xc   :  { %35 = dma.hbm_to_vmem [thread:$0]  %s28_s23, 512, %s30_s27, [#allocation4], %s584_s17, %s584_s17, %s585_s18  }
   0xd   :  { %s81_s10 = sshll.u32 %s702_s7, 4  ;;  %s589_s2 = smov [#allocation11]   ;;  %s82_s10 = int_to_ptr.hbm [resolvable:$true] %s81_s10 }
   0xe   :  { %63 = dma.hbm_to_vmem [thread:$0]  %s56_s25, 512, %s58_s28, [#allocation7], %s584_s17, %s584_s17, %s585_s18  }
   0xf   :  { %s83_s11 = sshll.u32 %s589_s2, 4  ;;  %s84_s11 = int_to_ptr.vmem [resolvable:$true] %s83_s11 }
  0x10   :  { %89 = dma.hbm_to_vmem [thread:$0]  %s82_s10, 512, %s84_s11, [#allocation10], %s584_s17, %s584_s17, %s585_s18  }
  0x11   :  { %575 = dma.done.wait [#allocation4], 512  }
  0x12   :  { %576 = vsyncadd [#allocation4], 4294966784 }
  0x13   :  { %577 = dma.done.wait [#allocation7], 1024  }
  0x14   :  { %578 = vsyncadd [#allocation7], 4294966272 }
  0x15   :  { %579 = dma.done.wait [#allocation10], 1024  }
  0x16   :  { %580 = vsyncadd [#allocation10], 4294966272  ;;  %v590_v0 = vmov 0   ;;  %v123_v1 = vld [vmem:[%s696_s1 + $0x8] sm:$0xff]  ;;  %v122_v3 = vld [vmem:[%s696_s1] sm:$0xff]  ;;  %vm124_vm0 = vcmask 130048  }
  0x17   :  { %425 = vset.pattern.permute.xlu1 %v590_v0  ;;  %424 = vset.pattern.permute.xlu0 %v590_v0  ;;  %v117_v2 = vld [vmem:[%s695_s0 + $0x8] sm:$0xff]  ;;  %v116_v4 = vld [vmem:[%s695_s0] sm:$0xff]  ;;  %v210_v8 = vld [vmem:[#allocation6 + $0x18] sm:$0xff]  ;;  %vm267_vm1 = vcmask 261120   ;;  %vm341_vm2 = vcmask 15360   ;;  %s591_s24 = smov [#allocation12]  }
  0x18   :  { %426 = vset.pattern.permute.xlu2 %v590_v0  ;;  %151 = vmatpush.msra.mxu0 %v123_v1  ;;  %v118_v5 = vld [vmem:[%s698_s3] sm:$0xff]  ;;  %v208_v7 = vld [vmem:[#allocation6 + $0x8] sm:$0xff]  ;;  %v209_v12 = vld [vmem:[#allocation6 + $0x10] sm:$0xff]  ;;  %s384_s25 = sshll.u32 %s591_s24, 4  ;;  %vm377_vm6 = vcmask 8192   ;;  %s385_s25 = int_to_ptr.vmem [resolvable:$true] %s384_s25 }
  0x19   :  { %192 = vmatpush.msra.mxu1 %v117_v2  ;;  %v112_v6 = vld [vmem:[#allocation3] sm:$0xff]  ;;  %218 = vperm.xlu1 %425, %v208_v7   ;;  %v119_v9 = vld [vmem:[%s698_s3 + $0x8] sm:$0xff]  ;;  %v120_v13 = vld [vmem:[%s698_s3 + $0x10] sm:$0xff] }
  0x1a   :  { %152 = vmatpush.msra.mxu0 %v122_v3  ;;  %228 = vperm.xlu0 %424, %v210_v8   ;;  %v113_v10 = vld [vmem:[#allocation3 + $0x8] sm:$0xff]  ;;  %v207_v11 = vld [vmem:[#allocation6] sm:$0xff]  ;;  %v114_v14 = vld [vmem:[#allocation3 + $0x10] sm:$0xff] }
  0x1b   :  { %193 = vmatpush.msra.mxu1 %v116_v4  ;;  %398 = vmatmul.msk.f32.vlgmr.msra.gmra.mxu0 %vm124_vm0, %v118_v5  ;;  %v245_v15 = vld [vmem:[#allocation9 + $0x10] sm:$0xff]  ;;  %v246_v16 = vld [vmem:[#allocation9 + $0x18] sm:$0xff]  ;;  %v314_v19 = vld [vmem:[#allocation11 + $0x8] sm:$0xff] }
  0x1c   :  { %402 = vmatmul.msk.f32.vlgmr.msra.gmra.mxu1 %vm124_vm0, %v112_v6  ;;  %v121_v17 = vld [vmem:[%s698_s3 + $0x18] sm:$0xff]  ;;  %v315_v20 = vld [vmem:[#allocation11 + $0x10] sm:$0xff]  ;;  %v243_v25 = vld [vmem:[#allocation9] sm:$0xff] }
  0x1d   :  { %v115_v18 = vld [vmem:[#allocation3 + $0x18] sm:$0xff]  ;;  %249 = vperm.xlu2 %426, %v243_v25   ;;  %v244_v30 = vld [vmem:[#allocation9 + $0x8] sm:$0xff]  ;;  %v313_v43 = vld [vmem:[#allocation11] sm:$0xff]  ;;  %v356_v25 = vstv %s703_s8  ;;  %s386_s8 = sshll.u32 %s704_s9, 4  ;;  %s387_s8 = int_to_ptr.hbm [resolvable:$true] %s386_s8 }
  0x1e   :  { %v239_v48 = vld [vmem:[#allocation8] sm:$0xff]  ;;  %v240_v49 = vld [vmem:[#allocation8 + $0x8] sm:$0xff]  ;;  %v316_v50 = vld [vmem:[#allocation11 + $0x18] sm:$0xff] }
  0x1f   :  { %v241_v51 = vld [vmem:[#allocation8 + $0x10] sm:$0xff]  ;;  %v242_v52 = vld [vmem:[#allocation8 + $0x18] sm:$0xff] }
  0x21   :  { %213 = vperm.xlu1 %425, %v207_v11  }
  0x22   :  { %223 = vperm.xlu0 %424, %v209_v12  }
  0x23   :  { %399 = vmatmul.msk.f32.gmra.mxu0 %vm124_vm0, %v119_v9 }
  0x24   :  { %403 = vmatmul.msk.f32.gmra.mxu1 %vm124_vm0, %v113_v10 }
  0x25   :  { %254 = vperm.xlu2 %426, %v244_v30  }
  0x29   :  { %264 = vperm.xlu1 %425, %v246_v16  }
  0x2a   :  { %259 = vperm.xlu0 %424, %v245_v15  }
  0x2b   :  { %400 = vmatmul.msk.f32.gmra.mxu0 %vm124_vm0, %v120_v13 }
  0x2c   :  { %404 = vmatmul.msk.f32.gmra.mxu1 %vm124_vm0, %v114_v14 }
  0x2d   :  { %319 = vperm.xlu2 %426, %v313_v43  }
  0x31   :  { %329 = vperm.xlu1 %425, %v315_v20  }
  0x32   :  { %324 = vperm.xlu0 %424, %v314_v19  }
  0x33   :  { %401 = vmatmul.msk.f32.gmra.mxu0 %vm124_vm0, %v121_v17 }
  0x34   :  { %405 = vmatmul.msk.f32.gmra.mxu1 %vm124_vm0, %v115_v18 }
  0x35   :  { %334 = vperm.xlu2 %426, %v316_v50  }
  0x77   :  { %v250_v53 = vpop.permute.xlu2 %249 }
  0x7f   :  { %v255_v54 = vpop.permute.xlu2 %254 }
  0x87   :  { %v320_v1 = vpop.permute.xlu2 %319 }
  0x8b   :  { %v219_v29 = vpop.permute.xlu1 %218 }
  0x8c   :  { %v229_v26 = vpop.permute.xlu0 %228 }
  0x8f   :  { %v335_v14 = vpop.permute.xlu2 %334 }
  0x93   :  { %v214_v40 = vpop.permute.xlu1 %213 }
  0x94   :  { %v224_v36 = vpop.permute.xlu0 %223 }
  0x98   :  { %v154_v21 = vpop.f32.mrf.mxu0 }
  0x99   :  { %v195_v22 = vpop.f32.mrf.mxu1 }
  0x9a   :  { %v196_v37 = vadd.f32 %v195_v22, %v154_v21 }
  0x9b   :  { %v265_v58 = vpop.permute.xlu1 %264 }
  0x9c   :  { %v231_v44 = vadd.f32 %v214_v40, %v196_v37  ;;  %v260_v56 = vpop.permute.xlu0 %259 }
  0x9e   :  { %v235_v47 = vmax.f32 %v231_v44, 0.0 }
  0xa0   :  { %v157_v23 = vpop.f32.mrf.mxu0 }
  0xa1   :  { %v198_v24 = vpop.f32.mrf.mxu1 }
  0xa2   :  { %v199_v34 = vadd.f32 %v198_v24, %v157_v23 }
  0xa3   :  { %v330_v6 = vpop.permute.xlu1 %329 }
  0xa4   :  { %v232_v42 = vadd.f32 %v219_v29, %v199_v34  ;;  %v325_v3 = vpop.permute.xlu0 %324 }
  0xa6   :  { %v236_v46 = vmax.f32 %v232_v42, 0.0 }
  0xa8   :  { %v160_v27 = vpop.f32.mrf.mxu0 }
  0xa9   :  { %v201_v28 = vpop.f32.mrf.mxu1 }
  0xaa   :  { %v202_v31 = vadd.f32 %v201_v28, %v160_v27 }
  0xac   :  { %v233_v39 = vadd.f32 %v224_v36, %v202_v31 }
  0xae   :  { %v237_v45 = vmax.f32 %v233_v39, 0.0 }
  0xb0   :  { %v163_v32 = vpop.f32.mrf.mxu0 }
  0xb1   :  { %v204_v33 = vpop.f32.mrf.mxu1 }
  0xb2   :  { %v205_v35 = vadd.f32 %v204_v33, %v163_v32 }
  0xb4   :  { %v234_v38 = vadd.f32 %v229_v26, %v205_v35 }
  0xb6   :  { %v238_v41 = vmax.f32 %v234_v38, 0.0 }
  0xb8   :  { %292 = vmatpush.msra.mxu2 %v238_v41  ;;  %411 = vmatpush.msra.mxu3 %v238_v41 }
  0xba   :  { %293 = vmatpush.msra.mxu2 %v237_v45  ;;  %412 = vmatpush.msra.mxu3 %v237_v45 }
  0xbc   :  { %294 = vmatpush.msra.mxu2 %v236_v46  ;;  %413 = vmatpush.msra.mxu3 %v236_v46 }
  0xbe   :  { %295 = vmatpush.msra.mxu2 %v235_v47  ;;  %414 = vmatpush.msra.mxu3 %v235_v47 }
  0xbf   :  { %406 = vmatmul.msk.f32.vlgmr.msra.gmra.mxu2 %vm267_vm1, %v239_v48  ;;  %407 = vmatmul.msk.f32.vlgmr.msra.gmra.mxu3 %vm267_vm1, %v240_v49 }
  0xc7   :  { %408 = vmatmul.msk.f32.gmra.mxu3 %vm267_vm1, %v241_v51 }
  0xcf   :  { %409 = vmatmul.msk.f32.gmra.mxu3 %vm267_vm1, %v242_v52 }
 0x142   :  { %v300_v55 = vpop.f32.mrf.mxu3  ;;  %v297_v57 = vpop.f32.mrf.mxu2 }
 0x143   :  { %v298_v59 = vadd.f32 %v297_v57, %v250_v53  ;;  %v301_v60 = vadd.f32 %v300_v55, %v255_v54 }
 0x145   :  { %v309_v62 = vmax.f32 %v298_v59, 0.0  ;;  %v310_v63 = vmax.f32 %v301_v60, 0.0 }
 0x147   :  { %v337_v4 = vmul.f32 %v320_v1, %v309_v62  ;;  %v338_v5 = vmul.f32 %v325_v3, %v310_v63 }
 0x149   :  { %v342_v9 = vsel %vm341_vm2, %v337_v4, 0.0  ;;  %v343_v10 = vsel %vm341_vm2, %v338_v5, 0.0 }
 0x14a   :  { %v303_v61 = vpop.f32.mrf.mxu3  ;;  %v344_v15 = vadd.f32 %v343_v10, %v342_v9 }
 0x14b   :  { %v304_v0 = vadd.f32 %v303_v61, %v260_v56 }
 0x14d   :  { %v311_v2 = vmax.f32 %v304_v0, 0.0 }
 0x14f   :  { %v339_v7 = vmul.f32 %v330_v6, %v311_v2 }
 0x151   :  { %v345_v12 = vsel %vm341_vm2, %v339_v7, 0.0 }
 0x152   :  { %v306_v8 = vpop.f32.mrf.mxu3  ;;  %v346_v17 = vadd.f32 %v345_v12, %v344_v15 }
 0x153   :  { %v307_v11 = vadd.f32 %v306_v8, %v265_v58 }
 0x155   :  { %v312_v13 = vmax.f32 %v307_v11, 0.0 }
 0x157   :  { %v340_v16 = vmul.f32 %v335_v14, %v312_v13 }
 0x159   :  { %v347_v18 = vsel %vm341_vm2, %v340_v16, 0.0 }
 0x15a   :  { %v348_v19 = vadd.f32 %v347_v18, %v346_v17 }
 0x15c   :  { %v349_v20 = vrot.slane %v348_v19, 4 }
 0x15e   :  { %v350_v21 = vadd.f32 %v349_v20, %v348_v19 }
 0x160   :  { %v351_v22 = vrot.slane %v350_v21, 2 }
 0x162   :  { %v352_v23 = vadd.f32 %v351_v22, %v350_v21 }
 0x164   :  { %v353_v24 = vrot.slane %v352_v23, 1 }
 0x166   :  { %v354_v26 = vadd.f32 %v353_v24, %v352_v23 }
 0x168   :  { %v357_v27 = vadd.f32 %v356_v25, %v354_v26 }
 0x16a   :  { %v410_v28 = vmul.f32 -1.442695, %v357_v27 }
 0x16c   :  { %427 = vpow2.f32 %v410_v28 }
 0x172   :  { %v428_v29 = vpop.eup %427 }
 0x173   :  { %v361_v30 = vadd.f32 1.0, %v428_v29 }
 0x175   :  { %429 = vrcp.f32 %v361_v30  ;;  %v373_v34 = vand.u32 2147483648, %v361_v30  ;;  %v371_v36 = vand.u32 2147483647, %v361_v30  ;;  %vm367_vm4 = vweird.f32 %v361_v30 }
 0x177   :  { %v374_v38 = vor.u32 1.1754944e-38, %v373_v34  ;;  %vm372_vm7 = vcmp.eq.f32.partialorder %v371_v36, 8.507059e+37 }
 0x17b   :  { %v430_v31 = vpop.eup %429 }
 0x17c   :  { %v363_v32 = vmul.f32 %v430_v31, %v361_v30  ;;  %vm368_vm3 = vweird.f32 %v430_v31 }
 0x17d   :  { %vm369_vm5 = vmor %vm367_vm4, %vm368_vm3 }
 0x17e   :  { %v364_v33 = vsub.f32 1.0, %v363_v32 }
 0x180   :  { %v365_v35 = vmul.f32 %v430_v31, %v364_v33 }
 0x182   :  { %v366_v37 = vadd.f32 %v430_v31, %v365_v35 }
 0x184   :  { %v370_v39 = vsel %vm369_vm5, %v430_v31, %v366_v37 }
 0x185   :  { %v375_v40 = vsel %vm372_vm7, %v374_v38, %v370_v39 }
 0x186   :  { %378 = vst.msk [vmem:[#allocation12] sm:$0x1] %vm377_vm6, %v375_v40 }
 0x187   :  { %389 = dma.vmem_to_hbm [thread:$0]  %s385_s25, 16, %s387_s8, [#allocation5]  }
 0x188   :  { %581 = dma.done.wait [#allocation5], 16  }
 0x189   :  { %582 = vsyncadd [#allocation5], 4294967280 }
 0x18a   :  { %394 = vsyncpa [#allocation4], 1 }
 0x18b   :  { %395 = vsyncpa [#allocation7], 1 }
 0x18c   :  { %396 = vsyncpa [#allocation10], 1 }
 0x18d   :  { %397 = vsyncpa [#allocation5], 1 }

</bundles_post_ra>
